<compile_context>
chip_gen: v7x
topology: tpu7x:2x2x1
jax: 0.10.0
libtpu: 0.0.40
codegen_flags: <defaults>
</compile_context>

<pallas_src>
import functools

import jax
import jax.numpy as jnp
from jax.experimental import pallas as pl
from jax.experimental.pallas import tpu as pltpu


def gru_cell_kernel(x_ref, h_ref,
                    w_stack_ref, whh_ref, wy_ref,
                    b_stack_ref, by_ref,
                    h_next_ref, y_ref,
                    hx_scr):
    """One fused GRU step on a (features, TB) batch tile.

    Exactly 3 MXU pushes on the serial path:
      gates  = W_stack @ [h; x] + [bz; br; bh]
      h_cand = tanh(Whh @ (r*h) + gates[2*n_h:])
      y      = Wy @ h_next + by
    Elementwise / activation math stays f32; MXU operands are cast to the
    (possibly bf16) weight dtype.
    """
    n_h = h_ref.shape[0]
    mm_dtype = w_stack_ref.dtype

    h = h_ref[...].astype(jnp.float32)                         # (n_h, TB)

    # Build concat([h; x]) once in VMEM scratch (matmul dtype) so the whole
    # input-side projection is a single (3*n_h, n_h+n_x) @ (n_h+n_x, TB) push.
    # (n_h is a multiple of the sublane tile, so both stores are aligned.)
    hx_scr[:n_h, :] = h.astype(mm_dtype)
    hx_scr[n_h:, :] = x_ref[...].astype(mm_dtype)

    gates = jnp.dot(w_stack_ref[...], hx_scr[...],
                    preferred_element_type=jnp.float32) + b_stack_ref[...]

    # z and r in one fused sigmoid on the stacked tile.
    zr = jax.nn.sigmoid(gates[:2 * n_h])
    z = zr[:n_h]
    r = zr[n_h:]

    # Candidate hidden state: h~ = tanh(Whh @ (r*h) + Whx @ x + bh).
    rh = (r * h).astype(mm_dtype)
    h_cand = jnp.tanh(
        jnp.dot(whh_ref[...], rh, preferred_element_type=jnp.float32)
        + gates[2 * n_h:])

    # h_next = z*h + (1-z)*h_cand, rewritten with one fewer VPU op.
    h_next = h_cand + z * (h - h_cand)
    h_next_ref[...] = h_next

    # Readout: y = Wy @ h_next + by.
    y_ref[...] = (jnp.dot(wy_ref[...], h_next.astype(mm_dtype),
                          preferred_element_type=jnp.float32)
                  + by_ref[...])


def prepare_params(params, *, matmul_dtype=jnp.float32):
    """One-time packing of the PyTorch-style parameters (hoisted off hot path).

    torch concat order is [h_prev; x_t], so columns [:n_h] of each gate matrix
    act on h and columns [n_h:] act on x.  W_stack applies to [h; x] directly:
        rows [0      : n_h  ] = Wz
        rows [n_h    : 2*n_h] = Wr
        rows [2*n_h  : 3*n_h] = [0 | Wh_x]   (h-columns zeroed; Whh kept apart)
    bf16 `matmul_dtype` is recommended on all TPU generations (v5e's MXU is
    natively bf16 and weight DMA bytes halve); elementwise math stays f32.
    """
    n_h = params["Wz"].shape[0]
    wh_x_only = params["Wh"].at[:, :n_h].set(0.0)
    w_stack = jnp.concatenate(
        [params["Wz"], params["Wr"], wh_x_only], axis=0)      # (3*n_h, n_h+n_x)
    b_stack = jnp.concatenate(
        [params["bz"], params["br"], params["bh"]], axis=0)   # (3*n_h, 1)
    return {
        "W_stack": w_stack.astype(matmul_dtype),
        "Whh": params["Wh"][:, :n_h].astype(matmul_dtype),    # (n_h, n_h)
        "Wy": params["Wy"].astype(matmul_dtype),               # (n_y, n_h)
        "b_stack": b_stack.astype(jnp.float32),
        "by": params["by"].astype(jnp.float32),
    }


@functools.partial(jax.jit, static_argnames=("batch_tile",))
def simple_gru_forward(packed, x_t, h_prev, *, batch_tile=512):
    """One GRU step.  x_t: (n_x, B), h_prev: (n_h, B) -> (h_next, y_pred)."""
    n_h = packed["Whh"].shape[0]
    n_in = packed["W_stack"].shape[1]
    n_x = n_in - n_h
    n_y = packed["Wy"].shape[0]
    B = x_t.shape[1]
    mm_dtype = packed["W_stack"].dtype

    # Batch (lane) tiling: grid over the batch axis so weights stay
    # VMEM-resident across the grid while activation tiles are
    # double-buffered.  Fall back to one full-batch block when the batch does
    # not divide the tile (full-array last dim is always a legal block).
    tb = batch_tile if (B >= batch_tile and B % batch_tile == 0) else B
    grid = (B // tb,)
    by_col = lambda b: (0, b)     # activations / outputs: block along batch
    resident = lambda b: (0, 0)   # weights / biases: same block every step

    h_next, y_pred = pl.pallas_call(
        gru_cell_kernel,
        grid=grid,
        in_specs=[
            pl.BlockSpec((n_x, tb), by_col),
            pl.BlockSpec((n_h, tb), by_col),
            pl.BlockSpec(packed["W_stack"].shape, resident),
            pl.BlockSpec(packed["Whh"].shape, resident),
            pl.BlockSpec(packed["Wy"].shape, resident),
            pl.BlockSpec(packed["b_stack"].shape, resident),
            pl.BlockSpec(packed["by"].shape, resident),
        ],
        out_specs=(pl.BlockSpec((n_h, tb), by_col),
                   pl.BlockSpec((n_y, tb), by_col)),
        out_shape=(jax.ShapeDtypeStruct((n_h, B), jnp.float32),
                   jax.ShapeDtypeStruct((n_y, B), jnp.float32)),
        scratch_shapes=[pltpu.VMEM((n_in, tb), mm_dtype)],
        compiler_params=pltpu.CompilerParams(
            # Batch columns are independent -> shard across both TCs on v7x
            # (near no-op on single-TC v5e/v6e).
            dimension_semantics=("parallel",),
            # Explicit scoped-VMEM budget; re-derive for large n_h/B per
            # generation (v7x: 64 MiB physical vs 128 MiB on v5e/v6e).
            vmem_limit_bytes=32 * 1024 * 1024),
    )(x_t.astype(jnp.float32), h_prev.astype(jnp.float32),
      packed["W_stack"], packed["Whh"], packed["Wy"],
      packed["b_stack"], packed["by"])
    return h_next, y_pred


def simple_gru_reference(params, x_t, h_prev):
    concat = jnp.concatenate((h_prev, x_t), axis=0)
    z = jax.nn.sigmoid(params["Wz"] @ concat + params["bz"])
    r = jax.nn.sigmoid(params["Wr"] @ concat + params["br"])
    concat_r = jnp.concatenate((r * h_prev, x_t), axis=0)
    h_cand = jnp.tanh(params["Wh"] @ concat_r + params["bh"])
    h_next = z * h_prev + (1.0 - z) * h_cand
    y_pred = params["Wy"] @ h_next + params["by"]
    return h_next, y_pred


def init_params(key, n_x, n_h, n_y):
    k1, k2, k3, k4 = jax.random.split(key, 4)
    return {
        "Wz": jax.random.normal(k1, (n_h, n_x + n_h), jnp.float32) * 0.01,
        "bz": jnp.zeros((n_h, 1), jnp.float32),
        "Wr": jax.random.normal(k2, (n_h, n_x + n_h), jnp.float32) * 0.01,
        "br": jnp.zeros((n_h, 1), jnp.float32),
        "Wh": jax.random.normal(k3, (n_h, n_x + n_h), jnp.float32) * 0.01,
        "bh": jnp.zeros((n_h, 1), jnp.float32),
        "Wy": jax.random.normal(k4, (n_y, n_h), jnp.float32) * 0.01,
        "by": jnp.zeros((n_y, 1), jnp.float32),
    }


if __name__ == "__main__":
    n_x, n_h, n_y, batch = 16, 32, 16, 8

    key = jax.random.PRNGKey(0)
    kp, kx, kh, kx2, kh2 = jax.random.split(key, 5)
    params = init_params(kp, n_x, n_h, n_y)

    # --- small batch (single block), f32 MXU operands: matches PyTorch f32
    #     semantics exactly.
    x_t = jax.random.normal(kx, (n_x, batch), jnp.float32)
    h_prev = jax.random.normal(kh, (n_h, batch), jnp.float32)
    h_ref, y_ref = simple_gru_reference(params, x_t, h_prev)

    packed_f32 = prepare_params(params, matmul_dtype=jnp.float32)
    h_next, y_pred = jax.block_until_ready(
        simple_gru_forward(packed_f32, x_t, h_prev))
    assert h_next.shape == (n_h, batch) and y_pred.shape == (n_y, batch)
    assert jnp.allclose(h_next, h_ref, atol=1e-5, rtol=1e-5)
    assert jnp.allclose(y_pred, y_ref, atol=1e-5, rtol=1e-5)

    # --- larger batch exercising the 1-D batch grid (2 tiles, "parallel"),
    #     weights VMEM-resident across the grid.
    big_b, tile = 256, 128
    x_big = jax.random.normal(kx2, (n_x, big_b), jnp.float32)
    h_big = jax.random.normal(kh2, (n_h, big_b), jnp.float32)
    h_ref_b, y_ref_b = simple_gru_reference(params, x_big, h_big)
    h_next_b, y_pred_b = jax.block_until_ready(
        simple_gru_forward(packed_f32, x_big, h_big, batch_tile=tile))
    assert jnp.allclose(h_next_b, h_ref_b, atol=1e-5, rtol=1e-5)
    assert jnp.allclose(y_pred_b, y_ref_b, atol=1e-5, rtol=1e-5)

    # --- bf16 MXU operands (recommended on all generations), f32 accumulation
    #     and f32 elementwise math.  Operands (incl. activations) are bf16,
    #     hence the looser tolerance.
    packed_bf16 = prepare_params(params, matmul_dtype=jnp.bfloat16)
    h_next_bf, y_pred_bf = jax.block_until_ready(
        simple_gru_forward(packed_bf16, x_t, h_prev))
    assert jnp.allclose(h_next_bf, h_ref, atol=5e-3, rtol=5e-2)
    assert jnp.allclose(y_pred_bf, y_ref, atol=5e-3, rtol=5e-2)

    print("KERNEL_OK")
</pallas_src>

<mosaic_0001>
module attributes {stable_mosaic.version = 11 : i64} {
  func.func @gru_cell_kernel(%arg0: i32, %arg1: memref<16x8xf32, #tpu.memory_space<vmem>>, %arg2: memref<32x8xf32, #tpu.memory_space<vmem>>, %arg3: memref<96x48xf32, #tpu.memory_space<vmem>>, %arg4: memref<32x32xf32, #tpu.memory_space<vmem>>, %arg5: memref<16x32xf32, #tpu.memory_space<vmem>>, %arg6: memref<96x1xf32, #tpu.memory_space<vmem>>, %arg7: memref<16x1xf32, #tpu.memory_space<vmem>>, %arg8: memref<32x8xf32, #tpu.memory_space<vmem>>, %arg9: memref<16x8xf32, #tpu.memory_space<vmem>>, %arg10: memref<48x8xf32, #tpu.memory_space<vmem>>) attributes {dimension_semantics = [#tpu.dimension_semantics<parallel>], iteration_bounds = array<i64: 1>, scalar_prefetch = 0 : i64, scratch_operands = 1 : i64, tpu.core_type = #tpu.core_type<tc>, window_params = [{transform_indices = @transform_0, window_bounds = array<i64: 16, 8>}, {transform_indices = @transform_1, window_bounds = array<i64: 32, 8>}, {pipeline_mode = #tpu.pipeline_mode<synchronous>, transform_indices = @transform_2, window_bounds = array<i64: 96, 48>}, {pipeline_mode = #tpu.pipeline_mode<synchronous>, transform_indices = @transform_3, window_bounds = array<i64: 32, 32>}, {pipeline_mode = #tpu.pipeline_mode<synchronous>, transform_indices = @transform_4, window_bounds = array<i64: 16, 32>}, {pipeline_mode = #tpu.pipeline_mode<synchronous>, transform_indices = @transform_5, window_bounds = array<i64: 96, 1>}, {pipeline_mode = #tpu.pipeline_mode<synchronous>, transform_indices = @transform_6, window_bounds = array<i64: 16, 1>}, {transform_indices = @transform_7, window_bounds = array<i64: 32, 8>}, {transform_indices = @transform_8, window_bounds = array<i64: 16, 8>}]} {
    %c0 = arith.constant 0 : index
    %c0_0 = arith.constant 0 : index
    %0 = vector.load %arg2[%c0, %c0_0] : memref<32x8xf32, #tpu.memory_space<vmem>>, vector<32x8xf32>
    %c0_1 = arith.constant 0 : index
    %c0_2 = arith.constant 0 : index
    %1 = vector.load %arg10[%c0_1, %c0_2] : memref<48x8xf32, #tpu.memory_space<vmem>>, vector<32x8xf32>
    tpu.vector_store %arg10[%c0_1, %c0_2], %0 {strides = array<i32>} : memref<48x8xf32, #tpu.memory_space<vmem>>, vector<32x8xf32>,
    %c0_3 = arith.constant 0 : index
    %c0_4 = arith.constant 0 : index
    %2 = vector.load %arg1[%c0_3, %c0_4] : memref<16x8xf32, #tpu.memory_space<vmem>>, vector<16x8xf32>
    %c32 = arith.constant 32 : index
    %c0_5 = arith.constant 0 : index
    %3 = vector.load %arg10[%c32, %c0_5] : memref<48x8xf32, #tpu.memory_space<vmem>>, vector<16x8xf32>
    tpu.vector_store %arg10[%c32, %c0_5], %2 {strides = array<i32>} : memref<48x8xf32, #tpu.memory_space<vmem>>, vector<16x8xf32>,
    %c0_6 = arith.constant 0 : index
    %c0_7 = arith.constant 0 : index
    %4 = vector.load %arg3[%c0_6, %c0_7] : memref<96x48xf32, #tpu.memory_space<vmem>>, vector<96x48xf32>
    %c0_8 = arith.constant 0 : index
    %c0_9 = arith.constant 0 : index
    %5 = vector.load %arg10[%c0_8, %c0_9] : memref<48x8xf32, #tpu.memory_space<vmem>>, vector<48x8xf32>
    %cst = arith.constant dense<0.000000e+00> : vector<96x8xf32>
    %6 = tpu.matmul %4, %5, %cst {dimension_numbers = #tpu.dot_dimension_numbers<[1], [0], [0], [1], [0, 0, 1, 1], [], []>} : vector<96x48xf32>, vector<48x8xf32>, vector<96x8xf32> -> vector<96x8xf32>
    %c0_10 = arith.constant 0 : index
    %c0_11 = arith.constant 0 : index
    %7 = vector.load %arg6[%c0_10, %c0_11] : memref<96x1xf32, #tpu.memory_space<vmem>>, vector<96x1xf32>
    %8 = vector.broadcast %7 : vector<96x1xf32> to vector<96x8xf32>
    %9 = arith.addf %6, %8 : vector<96x8xf32>
    %10 = vector.extract_strided_slice %9 {offsets = [0, 0], sizes = [64, 8], strides = [1, 1]} : vector<96x8xf32> to vector<64x8xf32>
    %11 = arith.negf %10 : vector<64x8xf32>
    %12 = math.exp %11 : vector<64x8xf32>
    %cst_12 = arith.constant 1.000000e+00 : f32
    %13 = vector.broadcast %cst_12 : f32 to vector<64x8xf32>
    %14 = arith.addf %13, %12 : vector<64x8xf32>
    %15 = arith.divf %13, %14 : vector<64x8xf32>
    %16 = vector.extract_strided_slice %15 {offsets = [0, 0], sizes = [32, 8], strides = [1, 1]} : vector<64x8xf32> to vector<32x8xf32>
    %17 = vector.extract_strided_slice %15 {offsets = [32, 0], sizes = [32, 8], strides = [1, 1]} : vector<64x8xf32> to vector<32x8xf32>
    %18 = arith.mulf %17, %0 : vector<32x8xf32>
    %c0_13 = arith.constant 0 : index
    %c0_14 = arith.constant 0 : index
    %19 = vector.load %arg4[%c0_13, %c0_14] : memref<32x32xf32, #tpu.memory_space<vmem>>, vector<32x32xf32>
    %cst_15 = arith.constant dense<0.000000e+00> : vector<32x8xf32>
    %20 = tpu.matmul %19, %18, %cst_15 {dimension_numbers = #tpu.dot_dimension_numbers<[1], [0], [0], [1], [0, 0, 1, 1], [], []>} : vector<32x32xf32>, vector<32x8xf32>, vector<32x8xf32> -> vector<32x8xf32>
    %21 = vector.extract_strided_slice %9 {offsets = [64, 0], sizes = [32, 8], strides = [1, 1]} : vector<96x8xf32> to vector<32x8xf32>
    %22 = arith.addf %20, %21 : vector<32x8xf32>
    %23 = math.tanh %22 : vector<32x8xf32>
    %24 = arith.subf %0, %23 : vector<32x8xf32>
    %25 = arith.mulf %16, %24 : vector<32x8xf32>
    %26 = arith.addf %23, %25 : vector<32x8xf32>
    %c0_16 = arith.constant 0 : index
    %c0_17 = arith.constant 0 : index
    %27 = vector.load %arg8[%c0_16, %c0_17] : memref<32x8xf32, #tpu.memory_space<vmem>>, vector<32x8xf32>
    tpu.vector_store %arg8[%c0_16, %c0_17], %26 {strides = array<i32>} : memref<32x8xf32, #tpu.memory_space<vmem>>, vector<32x8xf32>,
    %c0_18 = arith.constant 0 : index
    %c0_19 = arith.constant 0 : index
    %28 = vector.load %arg5[%c0_18, %c0_19] : memref<16x32xf32, #tpu.memory_space<vmem>>, vector<16x32xf32>
    %cst_20 = arith.constant dense<0.000000e+00> : vector<16x8xf32>
    %29 = tpu.matmul %28, %26, %cst_20 {dimension_numbers = #tpu.dot_dimension_numbers<[1], [0], [0], [1], [0, 0, 1, 1], [], []>} : vector<16x32xf32>, vector<32x8xf32>, vector<16x8xf32> -> vector<16x8xf32>
    %c0_21 = arith.constant 0 : index
    %c0_22 = arith.constant 0 : index
    %30 = vector.load %arg7[%c0_21, %c0_22] : memref<16x1xf32, #tpu.memory_space<vmem>>, vector<16x1xf32>
    %31 = vector.broadcast %30 : vector<16x1xf32> to vector<16x8xf32>
    %32 = arith.addf %29, %31 : vector<16x8xf32>
    %c0_23 = arith.constant 0 : index
    %c0_24 = arith.constant 0 : index
    %33 = vector.load %arg9[%c0_23, %c0_24] : memref<16x8xf32, #tpu.memory_space<vmem>>, vector<16x8xf32>
    tpu.vector_store %arg9[%c0_23, %c0_24], %32 {strides = array<i32>} : memref<16x8xf32, #tpu.memory_space<vmem>>, vector<16x8xf32>,
    return
  }
  func.func @transform_0(%arg0: i32) -> (i32, i32) {
    %c0_i32 = arith.constant 0 : i32
    %c0_i32_0 = arith.constant 0 : i32
    return %c0_i32, %arg0 : i32, i32
  }
  func.func @transform_1(%arg0: i32) -> (i32, i32) {
    %c0_i32 = arith.constant 0 : i32
    %c0_i32_0 = arith.constant 0 : i32
    return %c0_i32, %arg0 : i32, i32
  }
  func.func @transform_2(%arg0: i32) -> (i32, i32) {
    %c0_i32 = arith.constant 0 : i32
    %c0_i32_0 = arith.constant 0 : i32
    %c0_i32_1 = arith.constant 0 : i32
    return %c0_i32, %c0_i32_0 : i32, i32
  }
  func.func @transform_3(%arg0: i32) -> (i32, i32) {
    %c0_i32 = arith.constant 0 : i32
    %c0_i32_0 = arith.constant 0 : i32
    %c0_i32_1 = arith.constant 0 : i32
    return %c0_i32, %c0_i32_0 : i32, i32
  }
  func.func @transform_4(%arg0: i32) -> (i32, i32) {
    %c0_i32 = arith.constant 0 : i32
    %c0_i32_0 = arith.constant 0 : i32
    %c0_i32_1 = arith.constant 0 : i32
    return %c0_i32, %c0_i32_0 : i32, i32
  }
  func.func @transform_5(%arg0: i32) -> (i32, i32) {
    %c0_i32 = arith.constant 0 : i32
    %c0_i32_0 = arith.constant 0 : i32
    %c0_i32_1 = arith.constant 0 : i32
    return %c0_i32, %c0_i32_0 : i32, i32
  }
  func.func @transform_6(%arg0: i32) -> (i32, i32) {
    %c0_i32 = arith.constant 0 : i32
    %c0_i32_0 = arith.constant 0 : i32
    %c0_i32_1 = arith.constant 0 : i32
    return %c0_i32, %c0_i32_0 : i32, i32
  }
  func.func @transform_7(%arg0: i32) -> (i32, i32) {
    %c0_i32 = arith.constant 0 : i32
    %c0_i32_0 = arith.constant 0 : i32
    return %c0_i32, %arg0 : i32, i32
  }
  func.func @transform_8(%arg0: i32) -> (i32, i32) {
    %c0_i32 = arith.constant 0 : i32
    %c0_i32_0 = arith.constant 0 : i32
    return %c0_i32, %arg0 : i32, i32
  }
}

</mosaic_0001>

<bundles_post_ra>
// kernel: simple_gru_forward.1
= control target key start
LH: loop header
LB: loop body
LE: loop exit
PB: predicated region body
PF: predicated region fallthrough
CT: control target
= control target key end

     0   :  { %vm32_vm0 = vcmask 64512   ;;  %vm131_vm1 = vcmask 392192   ;;  %v770_v3 = vmov 0   ;;  %vm349_vm2 = vcmask 261120   ;;  %s1004_s1 = inlined_call_operand.vmem [shape: f32[32,8], index: 1, kind: input, shape index: {}]   ;;  %s1005_s0 = inlined_call_operand.vmem [shape: f32[16,8], index: 0, kind: input, shape index: {}]   ;;  %s1006_s2 = inlined_call_operand.vmem [shape: f32[96,48], index: 2, kind: input, shape index: {}]   ;;  %s1007_s5 = inlined_call_operand.vmem [shape: f32[96,1], index: 5, kind: input, shape index: {}]   ;;  %s1008_s6 = inlined_call_operand.vmem [shape: f32[16,1], index: 6, kind: input, shape index: {}]   ;;  %s1009_s3 = inlined_call_operand.vmem [shape: f32[32,32], index: 3, kind: input, shape index: {}]   ;;  %s1010_s4 = inlined_call_operand.vmem [shape: f32[16,32], index: 4, kind: input, shape index: {}]   ;;  %s1011_s7 = inlined_call_operand.vmem [shape: f32[32,8], index: 7, kind: output, shape index: {0}]   ;;  %s1012_s8 = inlined_call_operand.vmem [shape: f32[16,8], index: 8, kind: output, shape index: {1}]  }
   0x1   :  { %v819_v0 = vld [vmem:[%s1004_s1] sm:$0xff]  ;;  %v824_v1 = vld [vmem:[%s1004_s1 + $0x8] sm:$0xff]  ;;  %v829_v2 = vld [vmem:[%s1004_s1 + $0x10] sm:$0xff]  ;;  %728 = vset.pattern.permute.xlu0 %v770_v3  ;;  %729 = vset.pattern.permute.xlu1 %v770_v3 }
   0x2   :  { %33 = vst.msk [vmem:[#allocation2] sm:$0xff] %vm32_vm0, %v819_v0  ;;  %34 = vst.msk [vmem:[#allocation2 + $0x8] sm:$0xff] %vm32_vm0, %v824_v1  ;;  %v838_v4 = vld [vmem:[%s1004_s1 + $0x18] sm:$0xff]  ;;  %v37_v5 = vld [vmem:[%s1005_s0] sm:$0xff] }
   0x3   :  { %35 = vst.msk [vmem:[#allocation2 + $0x10] sm:$0xff] %vm32_vm0, %v829_v2  ;;  %v38_v6 = vld [vmem:[%s1005_s0 + $0x8] sm:$0xff]  ;;  %36 = vst.msk [vmem:[#allocation2 + $0x18] sm:$0xff] %vm32_vm0, %v838_v4  ;;  %v41_v7 = vld [vmem:[%s1006_s2] sm:$0xff] }
   0x4   :  { %39 = vst.msk [vmem:[#allocation2 + $0x20] sm:$0xff] %vm32_vm0, %v37_v5  ;;  %40 = vst.msk [vmem:[#allocation2 + $0x28] sm:$0xff] %vm32_vm0, %v38_v6  ;;  %v45_v8 = vld [vmem:[%s1006_s2 + $0x20] sm:$0xff]  ;;  %642 = vmatprep.mubr.msk.f32.mxu0 %vm131_vm1, %v41_v7  ;;  %v65_v10 = vld [vmem:[%s1007_s5 + $0x30] sm:$0xff] }
   0x5   :  { %648 = vmatprep.mubr.msk.f32.mxu1 %vm131_vm1, %v45_v8  ;;  %v63_v9 = vld [vmem:[%s1007_s5 + $0x20] sm:$0xff]  ;;  %103 = vperm.xlu1 %729, %v65_v10   ;;  %v64_v19 = vld [vmem:[%s1007_s5 + $0x28] sm:$0xff]  ;;  %v66_v20 = vld [vmem:[%s1007_s5 + $0x38] sm:$0xff] }
   0x6   :  { %93 = vperm.xlu0 %728, %v63_v9   ;;  %v59_v22 = vld [vmem:[%s1007_s5] sm:$0xff]  ;;  %v60_v23 = vld [vmem:[%s1007_s5 + $0x8] sm:$0xff]  ;;  %v61_v24 = vld [vmem:[%s1007_s5 + $0x10] sm:$0xff] }
   0x7   :  { %v62_v25 = vld [vmem:[%s1007_s5 + $0x18] sm:$0xff]  ;;  %v42_v26 = vld [vmem:[%s1006_s2 + $0x8] sm:$0xff]  ;;  %v43_v28 = vld [vmem:[%s1006_s2 + $0x10] sm:$0xff] }
   0x8   :  { %v46_v27 = vld [vmem:[%s1006_s2 + $0x28] sm:$0xff]  ;;  %v47_v29 = vld [vmem:[%s1006_s2 + $0x30] sm:$0xff]  ;;  %v67_v30 = vld [vmem:[%s1007_s5 + $0x40] sm:$0xff] }
   0x9   :  { %v53_v11 = vld [vmem:[#allocation2] sm:$0xff]  ;;  %v54_v12 = vld [vmem:[#allocation2 + $0x8] sm:$0xff]  ;;  %108 = vperm.xlu1 %729, %v66_v20   ;;  %v44_v32 = vld [vmem:[%s1006_s2 + $0x18] sm:$0xff] }
   0xa   :  { %v55_v13 = vld [vmem:[#allocation2 + $0x10] sm:$0xff]  ;;  %v685_v14 = vpack.c.bf16 %v54_v12, %v53_v11  ;;  %v56_v15 = vld [vmem:[#allocation2 + $0x18] sm:$0xff]  ;;  %98 = vperm.xlu0 %728, %v64_v19   ;;  %v68_v31 = vld [vmem:[%s1007_s5 + $0x48] sm:$0xff] }
   0xb   :  { %v689_v16 = vpack.c.bf16 %v56_v15, %v55_v13  ;;  %v57_v17 = vld [vmem:[#allocation2 + $0x20] sm:$0xff]  ;;  %v58_v18 = vld [vmem:[#allocation2 + $0x28] sm:$0xff]  ;;  %v48_v33 = vld [vmem:[%s1006_s2 + $0x38] sm:$0xff] }
   0xc   :  { %686 = vmatprep.subr.bf16.mxu0 %v685_v14  ;;  %713 = vmatprep.subr.bf16.mxu1 %v685_v14  ;;  %v693_v21 = vpack.c.bf16 %v58_v18, %v57_v17  ;;  %v49_v34 = vld [vmem:[%s1006_s2 + $0x40] sm:$0xff]  ;;  %v69_v35 = vld [vmem:[%s1007_s5 + $0x50] sm:$0xff]  ;;  %v70_v36 = vld [vmem:[%s1007_s5 + $0x58] sm:$0xff] }
   0xd   :  { %688 = vmatpush3.bf16.msra.mxu0 %v685_v14  ;;  %716 = vmatpush3.bf16.msra.mxu1 %v685_v14  ;;  %v50_v37 = vld [vmem:[%s1006_s2 + $0x48] sm:$0xff]  ;;  %v51_v38 = vld [vmem:[%s1006_s2 + $0x50] sm:$0xff]  ;;  %v469_v39 = vld [vmem:[%s1008_s6] sm:$0xff] }
   0xe   :  { %690 = vmatprep.subr.bf16.mxu0 %v689_v16  ;;  %714 = vmatprep.subr.bf16.mxu1 %v689_v16  ;;  %v470_v40 = vld [vmem:[%s1008_s6 + $0x8] sm:$0xff]  ;;  %v52_v41 = vld [vmem:[%s1006_s2 + $0x58] sm:$0xff]  ;;  %v345_v42 = vld [vmem:[%s1009_s3] sm:$0xff] }
   0xf   :  { %73 = vperm.xlu0 %728, %v59_v22   ;;  %78 = vperm.xlu1 %729, %v60_v23  }
  0x11   :  { %692 = vmatpush3.bf16.msra.mxu0 %v689_v16  ;;  %717 = vmatpush3.bf16.msra.mxu1 %v689_v16 }
  0x12   :  { %694 = vmatprep.subr.bf16.mxu0 %v693_v21  ;;  %715 = vmatprep.subr.bf16.mxu1 %v693_v21 }
  0x13   :  { %83 = vperm.xlu0 %728, %v61_v24   ;;  %88 = vperm.xlu1 %729, %v62_v25   ;;  %v346_v25 = vld [vmem:[%s1009_s3 + $0x8] sm:$0xff] }
  0x15   :  { %696 = vmatpush3.bf16.msra.mxu0 %v693_v21  ;;  %718 = vmatpush3.bf16.msra.mxu1 %v693_v21 }
  0x17   :  { %113 = vperm.xlu0 %728, %v67_v30   ;;  %118 = vperm.xlu1 %729, %v68_v31  }
  0x18   :  { %643 = vmatmul.mubr.msk.f32.vlgmr.msra.gmra.mrb[0].mxu0 %vm131_vm1, %v42_v26  ;;  %649 = vmatmul.mubr.msk.f32.vlgmr.msra.gmra.mrb[0].mxu1 %vm131_vm1, %v46_v27  ;;  %v347_v26 = vld [vmem:[%s1009_s3 + $0x10] sm:$0xff]  ;;  %v348_v27 = vld [vmem:[%s1009_s3 + $0x18] sm:$0xff] }
  0x19   :  { %645 = vmatprep.mubr.msk.f32.mxu0 %vm131_vm1, %v43_v28  ;;  %651 = vmatprep.mubr.msk.f32.mxu1 %vm131_vm1, %v47_v29  ;;  %v467_v28 = vld [vmem:[%s1010_s4] sm:$0xff] }
  0x1b   :  { %123 = vperm.xlu0 %728, %v69_v35   ;;  %128 = vperm.xlu1 %729, %v70_v36  }
  0x1c   :  { %646 = vmatmul.mubr.msk.f32.gmra.mrb[2].mxu0 %vm131_vm1, %v44_v32  ;;  %652 = vmatmul.mubr.msk.f32.gmra.mrb[2].mxu1 %vm131_vm1, %v48_v33 }
  0x1d   :  { %654 = vmatprep.mubr.msk.f32.mxu1 %vm131_vm1, %v49_v34  ;;  %668 = vmatprep.mubr.msk.f32.mxu0 %vm349_vm2, %v345_v42 }
  0x1f   :  { %473 = vperm.xlu0 %728, %v469_v39   ;;  %478 = vperm.xlu1 %729, %v470_v40  }
  0x20   :  { %655 = vmatmul.mubr.msk.f32.gmra.mrb[4].mxu1 %vm131_vm1, %v50_v37 }
  0x21   :  { %657 = vmatprep.mubr.msk.f32.mxu1 %vm131_vm1, %v51_v38 }
  0x24   :  { %658 = vmatmul.mubr.msk.f32.gmra.mrb[6].mxu1 %vm131_vm1, %v52_v41 }
  0x25   :  { %682 = vmatprep.mubr.msk.f32.mxu1 %vm349_vm2, %v467_v28 }
  0x84   :  { %v104_v44 = vpop.permute.xlu1 %103 }
  0x85   :  { %v94_v43 = vpop.permute.xlu0 %93 }
  0x88   :  { %v109_v52 = vpop.permute.xlu1 %108 }
  0x89   :  { %v99_v45 = vpop.permute.xlu0 %98 }
  0x8e   :  { %v79_v29 = vpop.permute.xlu1 %78  ;;  %v74_v30 = vpop.permute.xlu0 %73 }
  0x92   :  { %v89_v33 = vpop.permute.xlu1 %88  ;;  %v84_v34 = vpop.permute.xlu0 %83 }
  0x96   :  { %v119_v41 = vpop.permute.xlu1 %118  ;;  %v114_v42 = vpop.permute.xlu0 %113 }
  0xeb   :  { %v644_v46 = vpop.f32.mrb[0].mxu0  ;;  %v650_v47 = vpop.f32.mrb[0].mxu1 }
  0xec   :  { %v260_v48 = vadd.f32 %v650_v47, %v99_v45  ;;  %v234_v49 = vpop.f32.mrb[1].mxu0  ;;  %v254_v50 = vpop.f32.mrb[1].mxu1  ;;  %v240_v31 = vadd.f32 %v644_v46, %v79_v29 }
  0xed   :  { %v255_v51 = vadd.f32 %v254_v50, %v94_v43  ;;  %v235_v32 = vadd.f32 %v234_v49, %v74_v30 }
  0xee   :  { %v589_v53 = vmul.f32 -1.442695, %v260_v48  ;;  %v585_v35 = vmul.f32 -1.442695, %v240_v31 }
  0xef   :  { %v588_v54 = vmul.f32 -1.442695, %v255_v51  ;;  %v647_v55 = vpop.f32.mrb[2].mxu0  ;;  %v653_v56 = vpop.f32.mrb[2].mxu1  ;;  %v584_v37 = vmul.f32 -1.442695, %v235_v32 }
  0xf0   :  { %v270_v57 = vadd.f32 %v653_v56, %v109_v52  ;;  %v244_v58 = vpop.f32.mrb[3].mxu0  ;;  %v264_v59 = vpop.f32.mrb[3].mxu1  ;;  %730 = vpow2.f32 %v589_v53  ;;  %v250_v36 = vadd.f32 %v647_v55, %v89_v33 }
  0xf1   :  { %v265_v60 = vadd.f32 %v264_v59, %v104_v44  ;;  %732 = vpow2.f32 %v588_v54  ;;  %v245_v38 = vadd.f32 %v244_v58, %v84_v34  ;;  %v129_v52 = vpop.permute.xlu1 %128  ;;  %v124_v56 = vpop.permute.xlu0 %123 }
  0xf2   :  { %v591_v61 = vmul.f32 -1.442695, %v270_v57  ;;  %v587_v39 = vmul.f32 -1.442695, %v250_v36 }
  0xf3   :  { %v590_v62 = vmul.f32 -1.442695, %v265_v60  ;;  %v656_v63 = vpop.f32.mrb[4].mxu1  ;;  %v586_v40 = vmul.f32 -1.442695, %v245_v38 }
  0xf4   :  { %v274_v3 = vpop.f32.mrb[5].mxu1  ;;  %734 = vpow2.f32 %v591_v61  ;;  %v280_v45 = vadd.f32 %v656_v63, %v119_v41 }
  0xf5   :  { %736 = vpow2.f32 %v590_v62  ;;  %v275_v47 = vadd.f32 %v274_v3, %v114_v42 }
  0xf7   :  { %v946_v5 = vpop.f32.mrb[6].mxu1 }
  0xf8   :  { %v948_v6 = vpop.f32.mrb[7].mxu1  ;;  %v290_v57 = vadd.f32 %v946_v5, %v129_v52 }
  0xf9   :  { %v285_v58 = vadd.f32 %v948_v6, %v124_v56 }
  0xfa   :  { %v731_v7 = vpop.eup %730 }
  0xfb   :  { %v322_v8 = vadd.f32 1.0, %v731_v7  ;;  %v733_v9 = vpop.eup %732 }
  0xfc   :  { %v321_v10 = vadd.f32 1.0, %v733_v9 }
  0xfd   :  { %738 = vrcp.f32 %v322_v8 }
  0xfe   :  { %v735_v11 = vpop.eup %734  ;;  %740 = vrcp.f32 %v321_v10 }
  0xff   :  { %v324_v12 = vadd.f32 1.0, %v735_v11  ;;  %v737_v13 = vpop.eup %736 }
 0x100   :  { %v323_v14 = vadd.f32 1.0, %v737_v13 }
 0x101   :  { %742 = vrcp.f32 %v324_v12 }
 0x102   :  { %744 = vrcp.f32 %v323_v14 }
 0x103   :  { %746 = vpow2.f32 %v585_v35 }
 0x104   :  { %748 = vpow2.f32 %v584_v37 }
 0x105   :  { %750 = vpow2.f32 %v587_v39 }
 0x106   :  { %752 = vpow2.f32 %v586_v40 }
 0x107   :  { %v739_v15 = vpop.eup %738 }
 0x108   :  { %v342_v16 = vmul.f32 %v739_v15, %v824_v1  ;;  %v741_v17 = vpop.eup %740 }
 0x109   :  { %v341_v18 = vmul.f32 %v741_v17, %v819_v0 }
 0x10b   :  { %v743_v19 = vpop.eup %742  ;;  %v697_v20 = vpack.c.bf16 %v342_v16, %v341_v18 }
 0x10c   :  { %v344_v21 = vmul.f32 %v743_v19, %v838_v4  ;;  %v745_v22 = vpop.eup %744 }
 0x10d   :  { %698 = vmatprep.subr.bf16.mxu0 %v697_v20  ;;  %v343_v23 = vmul.f32 %v745_v22, %v829_v2  ;;  %v747_v43 = vpop.eup %746 }
 0x10e   :  { %700 = vmatpush3.bf16.msra.mxu0 %v697_v20  ;;  %v749_v44 = vpop.eup %748  ;;  %v318_v48 = vadd.f32 1.0, %v747_v43 }
 0x10f   :  { %v701_v24 = vpack.c.bf16 %v344_v21, %v343_v23  ;;  %v751_v51 = vpop.eup %750  ;;  %v317_v53 = vadd.f32 1.0, %v749_v44  ;;  %v468_v23 = vld [vmem:[%s1010_s4 + $0x8] sm:$0xff] }
 0x110   :  { %v753_v55 = vpop.eup %752  ;;  %v320_v60 = vadd.f32 1.0, %v751_v51 }
 0x111   :  { %702 = vmatprep.subr.bf16.mxu0 %v701_v24  ;;  %v319_v63 = vadd.f32 1.0, %v753_v55 }
 0x112   :  { %704 = vmatpush3.bf16.msra.mxu0 %v701_v24  ;;  %v479_v24 = vpop.permute.xlu1 %478 }
 0x115   :  { %669 = vmatmul.mubr.msk.f32.vlgmr.msra.gmra.mrb[4].mxu0 %vm349_vm2, %v346_v25 }
 0x116   :  { %671 = vmatprep.mubr.msk.f32.mxu0 %vm349_vm2, %v347_v26  ;;  %v474_v26 = vpop.permute.xlu0 %473 }
 0x119   :  { %672 = vmatmul.mubr.msk.f32.gmra.mrb[6].mxu0 %vm349_vm2, %v348_v27 }
 0x1e8   :  { %v670_v46 = vpop.f32.mrb[4].mxu0 }
 0x1e9   :  { %v434_v49 = vadd.f32 %v670_v46, %v280_v45  ;;  %v428_v50 = vpop.f32.mrb[5].mxu0 }
 0x1ea   :  { %v429_v54 = vadd.f32 %v428_v50, %v275_v47 }
 0x1eb   :  { %754 = vtanh.f32 %v434_v49 }
 0x1ec   :  { %756 = vtanh.f32 %v429_v54  ;;  %v673_v59 = vpop.f32.mrb[6].mxu0 }
 0x1ed   :  { %758 = vrcp.f32 %v318_v48  ;;  %v444_v61 = vadd.f32 %v673_v59, %v290_v57  ;;  %v438_v62 = vpop.f32.mrb[7].mxu0 }
 0x1ee   :  { %760 = vrcp.f32 %v317_v53  ;;  %v439_v3 = vadd.f32 %v438_v62, %v285_v58 }
 0x1ef   :  { %762 = vtanh.f32 %v444_v61 }
 0x1f0   :  { %764 = vtanh.f32 %v439_v3 }
 0x1f1   :  { %766 = vrcp.f32 %v320_v60 }
 0x1f2   :  { %768 = vrcp.f32 %v319_v63 }
 0x1f5   :  { %v755_v7 = vpop.eup %754 }
 0x1f6   :  { %v757_v8 = vpop.eup %756  ;;  %v452_v5 = vsub.f32 %v824_v1, %v755_v7 }
 0x1f7   :  { %v759_v9 = vpop.eup %758  ;;  %v451_v6 = vsub.f32 %v819_v0, %v757_v8 }
 0x1f8   :  { %v761_v10 = vpop.eup %760  ;;  %v456_v11 = vmul.f32 %v759_v9, %v452_v5 }
 0x1f9   :  { %v763_v12 = vpop.eup %762  ;;  %v455_v13 = vmul.f32 %v761_v10, %v451_v6 }
 0x1fa   :  { %v765_v14 = vpop.eup %764  ;;  %v460_v15 = vadd.f32 %v755_v7, %v456_v11  ;;  %v454_v16 = vsub.f32 %v838_v4, %v763_v12 }
 0x1fb   :  { %v767_v17 = vpop.eup %766  ;;  %v459_v18 = vadd.f32 %v757_v8, %v455_v13  ;;  %v453_v19 = vsub.f32 %v829_v2, %v765_v14 }
 0x1fc   :  { %v769_v20 = vpop.eup %768  ;;  %464 = vst.msk [vmem:[%s1011_s7 + $0x8] sm:$0xff] %vm32_vm0, %v460_v15  ;;  %v458_v1 = vmul.f32 %v767_v17, %v454_v16 }
 0x1fd   :  { %463 = vst.msk [vmem:[%s1011_s7] sm:$0xff] %vm32_vm0, %v459_v18  ;;  %v705_v0 = vpack.c.bf16 %v460_v15, %v459_v18  ;;  %v457_v21 = vmul.f32 %v769_v20, %v453_v19 }
 0x1fe   :  { %v462_v22 = vadd.f32 %v763_v12, %v458_v1 }
 0x1ff   :  { %706 = vmatprep.subr.bf16.mxu1 %v705_v0  ;;  %v461_v4 = vadd.f32 %v765_v14, %v457_v21 }
 0x200   :  { %708 = vmatpush3.bf16.msra.mxu1 %v705_v0  ;;  %466 = vst.msk [vmem:[%s1011_s7 + $0x18] sm:$0xff] %vm32_vm0, %v462_v22 }
 0x201   :  { %465 = vst.msk [vmem:[%s1011_s7 + $0x10] sm:$0xff] %vm32_vm0, %v461_v4  ;;  %v709_v2 = vpack.c.bf16 %v462_v22, %v461_v4 }
 0x203   :  { %710 = vmatprep.subr.bf16.mxu1 %v709_v2 }
 0x204   :  { %712 = vmatpush3.bf16.msra.mxu1 %v709_v2 }
 0x207   :  { %683 = vmatmul.mubr.msk.f32.vlgmr.msra.gmra.mrb[8].mxu1 %vm349_vm2, %v468_v23 }
 0x2da   :  { %v684_v25 = vpop.f32.mrb[8].mxu1 }
 0x2db   :  { %v559_v27 = vadd.f32 %v684_v25, %v479_v24  ;;  %v553_v28 = vpop.f32.mrb[9].mxu1 }
 0x2dc   :  { %v554_v29 = vadd.f32 %v553_v28, %v474_v26 }
 0x2dd   :  { %563 = vst.msk [vmem:[%s1012_s8 + $0x8] sm:$0xff] %vm32_vm0, %v559_v27 }
 0x2de   :  { %562 = vst.msk [vmem:[%s1012_s8] sm:$0xff] %vm32_vm0, %v554_v29 }

</bundles_post_ra>
